<compile_context>
chip_gen: v7x
topology: tpu7x:2x2x1
jax: 0.10.0
libtpu: 0.0.40
codegen_flags: <defaults>
</compile_context>

<pallas_src>
import math

import jax
import jax.numpy as jnp
from jax.experimental import pallas as pl
from jax.experimental.pallas import tpu as pltpu


def get_bond_feature_dims():
    # OGB bond feature vocabulary sizes: bond type, bond stereo, is_conjugated
    return [5, 6, 2]


BOND_DIMS = get_bond_feature_dims()
NUM_FEATURES = len(BOND_DIMS)                                     # 3
OFFSETS = tuple(sum(BOND_DIMS[:i]) for i in range(NUM_FEATURES))  # (0, 5, 11)
TOTAL_ROWS = sum(BOND_DIMS)                                       # 13
PAD_ROWS = ((TOTAL_ROWS + 7) // 8) * 8                            # 16
LANE = 128
SUBLANE = 8


def _round_up(x, m):
    return ((x + m - 1) // m) * m


def bond_encoder_kernel(attr_ref, table_ref, out_ref):
    # attr_ref : (te, 3) int32 raw bond features (offsets folded in below)
    # table_ref: (16, emb_dim) f32 concatenated + zero-padded tables (resident)
    # out_ref  : (te, emb_dim) f32 output tile
    idx = attr_ref[...]                                           # (te, 3)
    te = idx.shape[0]
    iota = jax.lax.broadcasted_iota(jnp.int32, (te, PAD_ROWS), 1)
    multihot = (iota == (idx[:, 0:1] + OFFSETS[0])).astype(jnp.float32)
    for f in range(1, NUM_FEATURES):
        multihot += (iota == (idx[:, f:f + 1] + OFFSETS[f])).astype(jnp.float32)
    # HIGHEST precision: keep the f32 gather-sum semantics (multihot entries
    # are exact 0.0/1.0, so the result matches the per-table lookups).
    out_ref[...] = jnp.dot(multihot, table_ref[...],
                           preferred_element_type=jnp.float32,
                           precision=jax.lax.Precision.HIGHEST)


def prepare_bond_table(tables):
    """Concatenate + pad the 3 per-feature tables -> (16, emb_dim) f32.

    Call once at parameter-init time (hoisted out of the per-call path).
    """
    table = jnp.concatenate([t.astype(jnp.float32) for t in tables], axis=0)
    return jnp.pad(table, ((0, PAD_ROWS - TOTAL_ROWS), (0, 0)))


def _vmem_bytes_estimate(te, emb_dim):
    lane_emb = _round_up(emb_dim, LANE)
    attr_buf = te * LANE * 4              # (te, 3) int32 lane-pads to 128
    out_buf = te * lane_emb * 4
    table_buf = PAD_ROWS * lane_emb * 4
    multihot = te * LANE * 4              # (te, 16) f32 scratch, lane-padded
    return 2 * (attr_buf + out_buf + table_buf) + multihot


def bond_encoder(edge_attr, table, *, tile_e=4096, vmem_limit_bytes=None):
    """BondEncoder.forward: sum of per-feature embedding lookups.

    edge_attr: int [E, 3]; table: prepare_bond_table(tables) -> f32 [16, emb_dim].
    Returns float32 [E, emb_dim].
    """
    E, F = edge_attr.shape
    assert F == NUM_FEATURES
    emb_dim = table.shape[1]
    attr = edge_attr.astype(jnp.int32)

    # Row-tile choice:
    #  * as large as possible (per-step overhead ~0.35 us; each step should
    #    move several us of HBM traffic, especially on v7x's 3.2 TB/s HBM),
    #  * bounded so the double-buffered working set stays well inside the
    #    smallest per-core VMEM (v7x: 64 MiB physical),
    #  * and, when E allows, >= 2 grid steps so the "parallel" axis can be
    #    split across both v7x TensorCores.
    te = _round_up(max(SUBLANE, min(tile_e, _round_up(E, SUBLANE))), SUBLANE)
    while te > 512 and _vmem_bytes_estimate(te, emb_dim) > (40 << 20):
        te = _round_up(te // 2, SUBLANE)
    if E >= 2 * SUBLANE and pl.cdiv(E, te) < 2:
        te = _round_up(pl.cdiv(E, 2), SUBLANE)

    if vmem_limit_bytes is None:
        vmem_limit_bytes = min(
            max(32 << 20, int(1.5 * _vmem_bytes_estimate(te, emb_dim))),
            64 << 20)

    return pl.pallas_call(
        bond_encoder_kernel,
        out_shape=jax.ShapeDtypeStruct((E, emb_dim), jnp.float32),
        grid_spec=pltpu.PrefetchScalarGridSpec(
            num_scalar_prefetch=0,
            grid=(pl.cdiv(E, te),),
            in_specs=[
                pl.BlockSpec((te, NUM_FEATURES), lambda i: (i, 0)),
                # constant index_map -> fetched once, stays resident in VMEM
                pl.BlockSpec((PAD_ROWS, emb_dim), lambda i: (0, 0)),
            ],
            out_specs=pl.BlockSpec((te, emb_dim), lambda i: (i, 0)),
        ),
        compiler_params=pltpu.CompilerParams(
            dimension_semantics=("parallel",),
            vmem_limit_bytes=vmem_limit_bytes),
    )(attr, table)


def init_bond_tables(key, emb_dim):
    """Xavier-uniform per-feature tables (mirrors torch.nn.init.xavier_uniform_)."""
    tables = []
    for dim in BOND_DIMS:
        key, sub = jax.random.split(key)
        bound = math.sqrt(6.0 / (dim + emb_dim))
        tables.append(jax.random.uniform(sub, (dim, emb_dim), jnp.float32,
                                         minval=-bound, maxval=bound))
    return tables


def reference_bond_encoder(edge_attr, tables):
    out = 0
    for f, tbl in enumerate(tables):
        out = out + tbl[edge_attr[:, f]]
    return out


if __name__ == "__main__":
    key = jax.random.PRNGKey(0)
    emb_dim = 32
    E = 100                       # deliberately not a multiple of 8 / tile_e

    k_tab, k_attr = jax.random.split(key)
    tables = init_bond_tables(k_tab, emb_dim)
    table = prepare_bond_table(tables)          # hoisted: done once at init

    cols = []
    for dim in BOND_DIMS:
        k_attr, sub = jax.random.split(k_attr)
        cols.append(jax.random.randint(sub, (E, 1), 0, dim, dtype=jnp.int32))
    edge_attr = jnp.concatenate(cols, axis=1)                   # (E, 3) int32

    out = bond_encoder(edge_attr, table)
    out = jax.block_until_ready(out)

    ref = reference_bond_encoder(edge_attr, tables)
    assert out.shape == (E, emb_dim)
    assert jnp.allclose(out, ref, atol=1e-5, rtol=1e-5), "mismatch vs reference"

    print("KERNEL_OK")
</pallas_src>

<mosaic_0001>
module attributes {stable_mosaic.version = 11 : i64} {
  func.func @bond_encoder_kernel(%arg0: i32, %arg1: memref<56x3xi32, #tpu.memory_space<vmem>>, %arg2: memref<16x32xf32, #tpu.memory_space<vmem>>, %arg3: memref<56x32xf32, #tpu.memory_space<vmem>>) attributes {dimension_semantics = [#tpu.dimension_semantics<parallel>], iteration_bounds = array<i64: 2>, scalar_prefetch = 0 : i64, scratch_operands = 0 : i64, tpu.core_type = #tpu.core_type<tc>, window_params = [{transform_indices = @transform_0, window_bounds = array<i64: 56, 3>}, {pipeline_mode = #tpu.pipeline_mode<synchronous>, transform_indices = @transform_1, window_bounds = array<i64: 16, 32>}, {transform_indices = @transform_2, window_bounds = array<i64: 56, 32>}]} {
    %c0 = arith.constant 0 : index
    %c0_0 = arith.constant 0 : index
    %0 = vector.load %arg1[%c0, %c0_0] : memref<56x3xi32, #tpu.memory_space<vmem>>, vector<56x3xi32>
    %1 = tpu.iota {dimensions = array<i32: 1>} : vector<56x16xi32>
    %2 = vector.extract_strided_slice %0 {offsets = [0, 0], sizes = [56, 1], strides = [1, 1]} : vector<56x3xi32> to vector<56x1xi32>
    %c0_i32 = arith.constant 0 : i32
    %3 = vector.broadcast %c0_i32 : i32 to vector<56x1xi32>
    %4 = arith.addi %2, %3 : vector<56x1xi32>
    %5 = vector.broadcast %4 : vector<56x1xi32> to vector<56x16xi32>
    %6 = arith.cmpi eq, %1, %5 : vector<56x16xi32>
    %7 = arith.extui %6 : vector<56x16xi1> to vector<56x16xi32>
    %8 = arith.sitofp %7 : vector<56x16xi32> to vector<56x16xf32>
    %9 = vector.extract_strided_slice %0 {offsets = [0, 1], sizes = [56, 1], strides = [1, 1]} : vector<56x3xi32> to vector<56x1xi32>
    %c5_i32 = arith.constant 5 : i32
    %10 = vector.broadcast %c5_i32 : i32 to vector<56x1xi32>
    %11 = arith.addi %9, %10 : vector<56x1xi32>
    %12 = vector.broadcast %11 : vector<56x1xi32> to vector<56x16xi32>
    %13 = arith.cmpi eq, %1, %12 : vector<56x16xi32>
    %14 = arith.extui %13 : vector<56x16xi1> to vector<56x16xi32>
    %15 = arith.sitofp %14 : vector<56x16xi32> to vector<56x16xf32>
    %16 = arith.addf %8, %15 : vector<56x16xf32>
    %17 = vector.extract_strided_slice %0 {offsets = [0, 2], sizes = [56, 1], strides = [1, 1]} : vector<56x3xi32> to vector<56x1xi32>
    %c11_i32 = arith.constant 11 : i32
    %18 = vector.broadcast %c11_i32 : i32 to vector<56x1xi32>
    %19 = arith.addi %17, %18 : vector<56x1xi32>
    %20 = vector.broadcast %19 : vector<56x1xi32> to vector<56x16xi32>
    %21 = arith.cmpi eq, %1, %20 : vector<56x16xi32>
    %22 = arith.extui %21 : vector<56x16xi1> to vector<56x16xi32>
    %23 = arith.sitofp %22 : vector<56x16xi32> to vector<56x16xf32>
    %24 = arith.addf %16, %23 : vector<56x16xf32>
    %c0_1 = arith.constant 0 : index
    %c0_2 = arith.constant 0 : index
    %25 = vector.load %arg2[%c0_1, %c0_2] : memref<16x32xf32, #tpu.memory_space<vmem>>, vector<16x32xf32>
    %cst = arith.constant dense<0.000000e+00> : vector<56x32xf32>
    %26 = tpu.matmul %24, %25, %cst {dimension_numbers = #tpu.dot_dimension_numbers<[1], [0], [0], [1], [0, 0, 1, 1], [], []>, precision = #tpu.contract_precision<fp32>} : vector<56x16xf32>, vector<16x32xf32>, vector<56x32xf32> -> vector<56x32xf32>
    %c0_3 = arith.constant 0 : index
    %c0_4 = arith.constant 0 : index
    %27 = vector.load %arg3[%c0_3, %c0_4] : memref<56x32xf32, #tpu.memory_space<vmem>>, vector<56x32xf32>
    tpu.vector_store %arg3[%c0_3, %c0_4], %26 {strides = array<i32>} : memref<56x32xf32, #tpu.memory_space<vmem>>, vector<56x32xf32>,
    return
  }
  func.func @transform_0(%arg0: i32) -> (i32, i32) {
    %c0_i32 = arith.constant 0 : i32
    %c0_i32_0 = arith.constant 0 : i32
    return %arg0, %c0_i32 : i32, i32
  }
  func.func @transform_1(%arg0: i32) -> (i32, i32) {
    %c0_i32 = arith.constant 0 : i32
    %c0_i32_0 = arith.constant 0 : i32
    %c0_i32_1 = arith.constant 0 : i32
    return %c0_i32, %c0_i32_0 : i32, i32
  }
  func.func @transform_2(%arg0: i32) -> (i32, i32) {
    %c0_i32 = arith.constant 0 : i32
    %c0_i32_0 = arith.constant 0 : i32
    return %arg0, %c0_i32 : i32, i32
  }
}

</mosaic_0001>

<bundles_post_ra>
// kernel: tpu_custom_call.1
= control target key start
LH: loop header
LB: loop body
LE: loop exit
PB: predicated region body
PF: predicated region fallthrough
CT: control target
= control target key end

     0   :  { %s1868_s9 = smov 0   ;;  %s1870_s10 = smov 0   ;;  %s2252_s0 = inlined_call_operand.vmem [shape: s32[100,3], index: 0, kind: input, shape index: {}]   ;;  %s2253_s1 = inlined_call_operand.vmem [shape: f32[16,32], index: 1, kind: input, shape index: {}]   ;;  %s2254_s2 = inlined_call_operand.vmem [shape: f32[100,32], index: 2, kind: output, shape index: {}]  }
   0x1   :  { %s1872_s11 = smov 0  }
   0x2 LB: > { %s1881_s12 = sadd.s32 4294967295, %s1813_s11   ;;  %s1883_s13 = sadd.s32 1, %s1813_s11   ;;  %s1813_s11 = sphi %s1872_s11, %s2261_s11   ;;  %s1809_s10 = sphi %s1870_s10, %s2260_s10   ;;  %s1805_s9 = sphi %s1868_s9, %s2259_s9  }
   0x3   : > { %s63_s14 = ssub.s32 %s1813_s11, %s1883_s13  ;;  %s66_s15 = sadd.s32 1, %s1809_s10 }
   0x4   : > { %p64_p0 = scmp.eq.s32.totalorder %s63_s14, 0  ;;  %p76_p1 = scmp.ne.s32.totalorder %s1809_s10, %s1805_s9 }
   0x5   : > { %p77_p2 = scmp.eq.s32.totalorder %s1881_s12, 1  ;;  %p1321_p3 = scmp.ge.s32.totalorder %s1813_s11, 1 }
   0x6   : > { %s1891_s16 = scalar_select %p64_p0, %s1809_s10, %s66_s15  }
   0x7   : > { %p1893_p4 = por %p77_p2, %p76_p1  ;;  %p121_p5 = scmp.lt.s32.totalorder %s1813_s11, 3 }
   0x9   : > { %p122_p6 = pnand %p1321_p3, %p121_p5 }
   0xa   : > { %s1898_s18 = smul.u32 (!%p122_p6), 7, %s1881_s12  ;;  %v1847_v0 = vmov (!%p122_p6), 0   ;;  %v1848_v6 = vmov (!%p122_p6), 2   ;;  %v1849_v9 = vmov (!%p122_p6), 1   ;;  %v328_v16 = vld [vmem:[%s2253_s1] sm:$0xff] (!%p122_p6)  ;;  %v329_v17 = vld [vmem:[%s2253_s1 + $0x8] sm:$0xff] (!%p122_p6)  ;;  %v172_v44 = vlaneseq (!%p122_p6) }
   0xb   : > { %125 = sbr.rel (%p122_p6) target bundleno = 555 (0x22b), region = 28  ;;  %1739 = vset.pattern.permute.xlu1 (!%p122_p6), %v1847_v0  ;;  %1738 = vset.pattern.permute.xlu0 (!%p122_p6), %v1847_v0  ;;  %v353_v18 = vand.u32 (!%p122_p6), 4294901760, %v328_v16  ;;  %v356_v19 = vand.u32 (!%p122_p6), 4294901760, %v329_v17  ;;  %v1850_v21 = vmov (!%p122_p6), 0.0|0.0   ;;  %vm1851_vm0 = vmmov (!%p122_p6), 0   ;;  %s143_s28 = sand.u32 (!%p122_p6), 1, %s1805_s9  }
   0xc   : > { %p151_p7 = scmp.lt.s32.totalorder (!%p122_p6), %s1898_s18, 12  ;;  %1570 = vmatprep.subr.bf16.mxu0 (!%p122_p6), %v1850_v21  ;;  %1561 = vmatprep.subr.bf16.mxu1 (!%p122_p6), %v1850_v21  ;;  %v1852_v24 = vmov (!%p122_p6), 0.0   ;;  %v1963_v45 = vand.u32 (!%p122_p6), 127, %v172_v44  ;;  %vm330_vm5 = vcmask (!%p122_p6), 130048   ;;  %s1642_s29 = smul.u32 (!%p122_p6), 56, %s143_s28 }
   0xd   : > { %v1926_v20 = vpack.c.bf16 (!%p122_p6), %v356_v19, %v353_v18  ;;  %1490 = vmatprep.mubr.msk.f32.mxu0 (!%p122_p6), %vm1851_vm0, %v1852_v24  ;;  %1415 = vmatprep.mubr.msk.f32.mxu1 (!%p122_p6), %vm1851_vm0, %v1852_v24  ;;  %v1943_v26 = vsub.f32 (!%p122_p6), %v328_v16, %v353_v18  ;;  %v1945_v27 = vsub.f32 (!%p122_p6), %v329_v17, %v356_v19 }
   0xe   : > { %s2180_s30 = scalar_lea.vmem (!%p122_p6), [#allocation2], %s1642_s29  }
   0xf   : > { %1572 = vmatpush3.bf16.msra.mxu0 (!%p122_p6), %v1926_v20  ;;  %1563 = vmatpush3.bf16.msra.mxu1 (!%p122_p6), %v1926_v20  ;;  %v492_v32 = vand.u32 (!%p122_p6), 4294901760, %v1943_v26  ;;  %v499_v33 = vand.u32 (!%p122_p6), 4294901760, %v1945_v27  ;;  %v1568_v41 = vpack.c.bf16 (!%p122_p6), %v1945_v27, %v1943_v26 }
  0x10   : > { %1564 = vmatprep.subr.bf16.mxu1 (!%p122_p6), %v1850_v21  ;;  %1573 = vmatprep.subr.bf16.mxu0 (!%p122_p6), %v1850_v21 }
  0x11   : > { %v493_v34 = vsub.f32 (!%p122_p6), %v1943_v26, %v492_v32  ;;  %v500_v35 = vsub.f32 (!%p122_p6), %v1945_v27, %v499_v33  ;;  %v1956_v36 = vpack.c.bf16 (!%p122_p6), %v499_v33, %v492_v32 }
  0x12   : > { %s152_s19 = scalar_select %p151_p7, %s1898_s18, 12 }
  0x13   : > { %v494_v38 = vand.u32 4294901760, %v493_v34  ;;  %v501_v39 = vand.u32 4294901760, %v500_v35  ;;  %s1085_s3 = ssub.s32 (%p1893_p4), 13, %s1898_s18  ;;  %s1356_s4 = smul.u32 (%p1893_p4), 56, %s1881_s12 }
  0x14   : > { %s1322_s20 = sshll.u32 %s152_s19, 3  ;;  %p1086_p8 = scmp.lt.s32.totalorder (%p1893_p4), %s1085_s3, 7 }
  0x15   : > { %s1907_s23 = scalar_lea.vmem %s2252_s0, %s1322_s20  ;;  %v1958_v40 = vpack.c.bf16 %v501_v39, %v494_v38  ;;  %s2203_s7 = scalar_lea.vmem (%p1893_p4), %s2254_s2, %s1356_s4  }
  0x16   : > { %v166_v1 = vld [vmem:[%s1907_s23 + $0x8] sm:$0xff]  ;;  %v165_v2 = vld [vmem:[%s1907_s23] sm:$0xff]  ;;  %v167_v5 = vld [vmem:[%s1907_s23 + $0x10] sm:$0xff] }
  0x17   : > { %178 = vperm.xlu1 %1739, %v166_v1   ;;  %175 = vperm.xlu0 %1738, %v165_v2   ;;  %v273_v3 = vadd.s32 11, %v166_v1  ;;  %v272_v4 = vadd.s32 11, %v165_v2  ;;  %v274_v7 = vadd.s32 11, %v167_v5  ;;  %v217_v8 = vadd.s32 5, %v166_v1  ;;  %v168_v11 = vld [vmem:[%s1907_s23 + $0x18] sm:$0xff]  ;;  %v169_v13 = vld [vmem:[%s1907_s23 + $0x20] sm:$0xff] }
  0x18   : > { %v216_v10 = vadd.s32 5, %v165_v2  ;;  %v219_v12 = vadd.s32 5, %v168_v11  ;;  %v218_v14 = vadd.s32 5, %v167_v5  ;;  %v220_v15 = vadd.s32 5, %v169_v13  ;;  %v170_v22 = vld [vmem:[%s1907_s23 + $0x28] sm:$0xff]  ;;  %v171_v25 = vld [vmem:[%s1907_s23 + $0x30] sm:$0xff] }
  0x19   : > { %v275_v23 = vadd.s32 11, %v168_v11  ;;  %v278_v28 = vadd.s32 11, %v171_v25  ;;  %v276_v29 = vadd.s32 11, %v169_v13  ;;  %v221_v30 = vadd.s32 5, %v170_v22 }
  0x1a   : > { %v277_v31 = vadd.s32 11, %v170_v22  ;;  %v222_v37 = vadd.s32 5, %v171_v25 }
  0x1b   : > { %1740 = vset.pattern.permute.xlu1 %v1848_v6  ;;  %1743 = vset.pattern.permute.xlu0 %v1848_v6 }
  0x1c   : > { %283 = vperm.xlu0 %1743, %v273_v3   ;;  %280 = vperm.xlu1 %1740, %v272_v4  }
  0x20   : > { %286 = vperm.xlu0 %1743, %v274_v7   ;;  %1741 = vset.pattern.permute.xlu1 %v1849_v9 }
  0x21   : > { %227 = vperm.xlu1 %1741, %v217_v8  }
  0x24   : > { %1745 = vset.pattern.permute.xlu0 %v1849_v9 }
  0x25   : > { %1742 = vset.pattern.permute.xlu1 %v1847_v0  ;;  %224 = vperm.xlu0 %1745, %v216_v10  }
  0x26   : > { %181 = vperm.xlu1 %1742, %v167_v5  }
  0x29   : > { %233 = vperm.xlu0 %1745, %v219_v12  }
  0x2a   : > { %1744 = vset.pattern.permute.xlu1 %v1849_v9 }
  0x2b   : > { %230 = vperm.xlu1 %1744, %v218_v14  }
  0x2d   : > { %236 = vperm.xlu0 %1745, %v220_v15  }
  0x2f   : > { %1746 = vset.pattern.permute.xlu1 %v1847_v0 }
  0x30   : > { %184 = vperm.xlu1 %1746, %v168_v11  }
  0x31   : > { %1750 = vset.pattern.permute.xlu0 %v1847_v0 }
  0x32   : > { %190 = vperm.xlu0 %1750, %v170_v22  }
  0x34   : > { %1747 = vset.pattern.permute.xlu1 %v1848_v6 }
  0x35   : > { %289 = vperm.xlu1 %1747, %v275_v23  }
  0x36   : > { %193 = vperm.xlu0 %1750, %v171_v25  }
  0x39   : > { %1748 = vset.pattern.permute.xlu1 %v1847_v0 }
  0x3a   : > { %187 = vperm.xlu1 %1748, %v169_v13   ;;  %1754 = vset.pattern.permute.xlu0 %v1848_v6 }
  0x3b   : > { %298 = vperm.xlu0 %1754, %v278_v28  }
  0x3e   : > { %1749 = vset.pattern.permute.xlu1 %v1848_v6 }
  0x3f   : > { %292 = vperm.xlu1 %1749, %v276_v29  }
  0x43   : > { %1751 = vset.pattern.permute.xlu1 %v1849_v9 }
  0x44   : > { %239 = vperm.xlu1 %1751, %v221_v30  }
  0x48   : > { %1752 = vset.pattern.permute.xlu1 %v1848_v6 }
  0x49   : > { %295 = vperm.xlu1 %1752, %v277_v31  }
  0x4d   : > { %1753 = vset.pattern.permute.xlu1 %v1849_v9 }
  0x4e   : > { %242 = vperm.xlu1 %1753, %v222_v37  }
  0x96   : > { %v179_v42 = vpop.permute.xlu1 %178  ;;  %v176_v43 = vpop.permute.xlu0 %175 }
  0x97   : > { %vm196_vm1 = vcmp.eq.s32.totalorder %v1963_v45, %v179_v42  ;;  %vm195_vm3 = vcmp.eq.s32.totalorder %v1963_v45, %v176_v43 }
  0x98   : > { %v1324_v50 = vsel %vm196_vm1, 1.0, %v1852_v24  ;;  %v1323_v54 = vsel %vm195_vm3, 1.0, %v1852_v24 }
  0x9b   : > { %v281_v46 = vpop.permute.xlu1 %280  ;;  %v284_v47 = vpop.permute.xlu0 %283 }
  0x9c   : > { %vm301_vm2 = vcmp.eq.s32.totalorder %v1963_v45, %v284_v47  ;;  %vm300_vm6 = vcmp.eq.s32.totalorder %v1963_v45, %v281_v46 }
  0x9d   : > { %v1338_v51 = vsel %vm301_vm2, 1.0, %v1852_v24  ;;  %v1337_v61 = vsel %vm300_vm6, 1.0, %v1852_v24 }
  0x9f   : > { %v287_v48 = vpop.permute.xlu0 %286 }
  0xa0   : > { %v228_v49 = vpop.permute.xlu1 %227  ;;  %vm302_vm8 = vcmp.eq.s32.totalorder %v1963_v45, %v287_v48 }
  0xa1   : > { %vm245_vm4 = vcmp.eq.s32.totalorder %v1963_v45, %v228_v49  ;;  %v1339_v1 = vsel %vm302_vm8, 1.0, %v1852_v24 }
  0xa2   : > { %v1331_v52 = vsel %vm245_vm4, 1.0, %v1852_v24 }
  0xa3   : > { %v266_v53 = vadd.f32 %v1331_v52, %v1324_v50 }
  0xa4   : > { %v225_v55 = vpop.permute.xlu0 %224 }
  0xa5   : > { %v322_v56 = vadd.f32 %v1338_v51, %v266_v53  ;;  %vm244_vm7 = vcmp.eq.s32.totalorder %v1963_v45, %v225_v55  ;;  %v182_v57 = vpop.permute.xlu1 %181 }
  0xa6   : > { %v1330_v58 = vsel %vm244_vm7, 1.0, %v1852_v24  ;;  %vm197_vm9 = vcmp.eq.s32.totalorder %v1963_v45, %v182_v57 }
  0xa7   : > { %v335_v59 = vsel %vm330_vm5, %v322_v56, 0  ;;  %v265_v60 = vadd.f32 %v1330_v58, %v1323_v54  ;;  %v1325_v5 = vsel %vm197_vm9, 1.0, %v1852_v24 }
  0xa8   : > { %v1979_v62 = vand.u32 4294901760, %v335_v59  ;;  %v234_v7 = vpop.permute.xlu0 %233 }
  0xa9   : > { %v321_v63 = vadd.f32 %v1337_v61, %v265_v60  ;;  %vm247_vm11 = vcmp.eq.s32.totalorder %v1963_v45, %v234_v7 }
  0xaa   : > { %v231_v0 = vpop.permute.xlu1 %230  ;;  %v1986_v3 = vsub.f32 %v335_v59, %v1979_v62  ;;  %v1333_v17 = vsel %vm247_vm11, 1.0, %v1852_v24 }
  0xab   : > { %v332_v2 = vsel %vm330_vm5, %v321_v63, 0  ;;  %vm246_vm10 = vcmp.eq.s32.totalorder %v1963_v45, %v231_v0 }
  0xac   : > { %v1988_v4 = vand.u32 4294901760, %v332_v2  ;;  %v1332_v6 = vsel %vm246_vm10, 1.0, %v1852_v24  ;;  %v431_v13 = vand.u32 4294901760, %v1986_v3  ;;  %v237_v32 = vpop.permute.xlu0 %236 }
  0xad   : > { %v267_v8 = vadd.f32 %v1332_v6, %v1325_v5  ;;  %vm248_vm15 = vcmp.eq.s32.totalorder %v1963_v45, %v237_v32 }
  0xae   : > { %v1993_v9 = vsub.f32 %v332_v2, %v1988_v4  ;;  %v432_v25 = vsub.f32 %v1986_v3, %v431_v13 }
  0xaf   : > { %v323_v10 = vadd.f32 %v1339_v1, %v267_v8  ;;  %v185_v11 = vpop.permute.xlu1 %184 }
  0xb0   : > { %vm198_vm12 = vcmp.eq.s32.totalorder %v1963_v45, %v185_v11  ;;  %v421_v12 = vand.u32 4294901760, %v1993_v9  ;;  %v433_v33 = vand.u32 4294901760, %v432_v25 }
  0xb1   : > { %v338_v14 = vsel %vm330_vm5, %v323_v10, 0  ;;  %v1326_v16 = vsel %vm198_vm12, 1.0, %v1852_v24  ;;  %v191_v46 = vpop.permute.xlu0 %190 }
  0xb2   : > { %v2000_v15 = vand.u32 4294901760, %v338_v14  ;;  %1491 = vmatmul.mubr.f32.vlgmr.msra.gmra.mrb[0].mxu0 %v421_v12  ;;  %v422_v18 = vsub.f32 %v1993_v9, %v421_v12  ;;  %v268_v28 = vadd.f32 %v1333_v17, %v1326_v16  ;;  %vm200_vm2 = vcmp.eq.s32.totalorder %v1963_v45, %v191_v46 }
  0xb3   : > { %1493 = vmatprep.mubr.msk.f32.mxu0 %vm1851_vm0, %v1852_v24  ;;  %1575 = vmatpush3.bf16.msra.mxu0 %v1956_v36  ;;  %v1328_v56 = vsel %vm200_vm2, 1.0, %v1852_v24 }
  0xb4   : > { %v2009_v19 = vsub.f32 %v338_v14, %v2000_v15  ;;  %v290_v22 = vpop.permute.xlu1 %289  ;;  %v423_v23 = vand.u32 4294901760, %v422_v18  ;;  %1576 = vmatprep.subr.bf16.mxu0 %v1850_v21 }
  0xb5   : > { %vm303_vm13 = vcmp.eq.s32.totalorder %v1963_v45, %v290_v22  ;;  %v194_v54 = vpop.permute.xlu0 %193 }
  0xb6   : > { %v1340_v29 = vsel %vm303_vm13, 1.0, %v1852_v24  ;;  %1416 = vmatmul.mubr.f32.vlgmr.msra.gmra.mrb[0].mxu1 %v423_v23  ;;  %1494 = vmatmul.mubr.f32.gmra.mrb[2].mxu0 %v431_v13  ;;  %v441_v30 = vand.u32 4294901760, %v2009_v19  ;;  %vm201_vm6 = vcmp.eq.s32.totalorder %v1963_v45, %v194_v54 }
  0xb7   : > { %v324_v31 = vadd.f32 %v1340_v29, %v268_v28  ;;  %1418 = vmatprep.mubr.msk.f32.mxu1 %vm1851_vm0, %v1852_v24  ;;  %1496 = vmatprep.mubr.msk.f32.mxu0 %vm1851_vm0, %v1852_v24  ;;  %v1329_v8 = vsel %vm201_vm6, 1.0, %v1852_v24 }
  0xb8   : > { %v442_v34 = vsub.f32 %v2009_v19, %v441_v30  ;;  %1566 = vmatpush3.bf16.msra.mxu1 %v1958_v40  ;;  %v1334_v40 = vsel %vm248_vm15, 1.0, %v1852_v24 }
  0xb9   : > { %v341_v35 = vsel %vm330_vm5, %v324_v31, 0  ;;  %v188_v36 = vpop.permute.xlu1 %187  ;;  %1567 = vmatprep.subr.bf16.mxu1 %v1850_v21 }
  0xba   : > { %v2024_v37 = vand.u32 4294901760, %v341_v35  ;;  %vm199_vm14 = vcmp.eq.s32.totalorder %v1963_v45, %v188_v36  ;;  %1419 = vmatmul.mubr.f32.gmra.mrb[2].mxu1 %v433_v33  ;;  %1497 = vmatmul.mubr.f32.gmra.mrb[4].mxu0 %v441_v30  ;;  %v443_v21 = vand.u32 4294901760, %v442_v34  ;;  %v299_v61 = vpop.permute.xlu0 %298 }
  0xbb   : > { %1421 = vmatprep.mubr.msk.f32.mxu1 %vm1851_vm0, %v1852_v24  ;;  %1499 = vmatprep.mubr.msk.f32.mxu0 %vm1851_vm0, %v1852_v24  ;;  %v1327_v39 = vsel %vm199_vm14, 1.0, %v1852_v24  ;;  %vm306_vm7 = vcmp.eq.s32.totalorder %v1963_v45, %v299_v61 }
  0xbc   : > { %v2033_v38 = vsub.f32 %v341_v35, %v2024_v37  ;;  %v269_v44 = vadd.f32 %v1334_v40, %v1327_v39  ;;  %v1343_v11 = vsel %vm306_vm7, 1.0, %v1852_v24 }
  0xbe   : > { %v293_v42 = vpop.permute.xlu1 %292  ;;  %1422 = vmatmul.mubr.f32.gmra.mrb[4].mxu1 %v443_v21  ;;  %v451_v43 = vand.u32 4294901760, %v2033_v38 }
  0xbf   : > { %vm304_vm1 = vcmp.eq.s32.totalorder %v1963_v45, %v293_v42  ;;  %1424 = vmatprep.mubr.msk.f32.mxu1 %vm1851_vm0, %v1852_v24 }
  0xc0   : > { %v1341_v47 = vsel %vm304_vm1, 1.0, %v1852_v24  ;;  %1500 = vmatmul.mubr.f32.gmra.mrb[6].mxu0 %v451_v43  ;;  %v452_v48 = vsub.f32 %v2033_v38, %v451_v43 }
  0xc1   : > { %v325_v49 = vadd.f32 %v1341_v47, %v269_v44  ;;  %1502 = vmatprep.mubr.msk.f32.mxu0 %vm1851_vm0, %v1852_v24 }
  0xc2   : > { %v453_v50 = vand.u32 4294901760, %v452_v48 }
  0xc3   : > { %v344_v51 = vsel %vm330_vm5, %v325_v49, 0  ;;  %v240_v52 = vpop.permute.xlu1 %239 }
  0xc4   : > { %v2047_v53 = vand.u32 4294901760, %v344_v51  ;;  %vm249_vm3 = vcmp.eq.s32.totalorder %v1963_v45, %v240_v52  ;;  %1425 = vmatmul.mubr.f32.gmra.mrb[6].mxu1 %v453_v50 }
  0xc5   : > { %1427 = vmatprep.mubr.msk.f32.mxu1 %vm1851_vm0, %v1852_v24  ;;  %v1335_v57 = vsel %vm249_vm3, 1.0, %v1852_v24 }
  0xc6   : > { %v2053_v55 = vsub.f32 %v344_v51, %v2047_v53  ;;  %v270_v60 = vadd.f32 %v1335_v57, %v1328_v56 }
  0xc8   : > { %v296_v58 = vpop.permute.xlu1 %295  ;;  %v461_v59 = vand.u32 4294901760, %v2053_v55 }
  0xc9   : > { %vm305_vm4 = vcmp.eq.s32.totalorder %v1963_v45, %v296_v58 }
  0xca   : > { %v1342_v63 = vsel %vm305_vm4, 1.0, %v1852_v24  ;;  %1503 = vmatmul.mubr.f32.gmra.mrb[8].mxu0 %v461_v59  ;;  %v462_v0 = vsub.f32 %v2053_v55, %v461_v59 }
  0xcb   : > { %v326_v1 = vadd.f32 %v1342_v63, %v270_v60  ;;  %1505 = vmatprep.mubr.msk.f32.mxu0 %vm1851_vm0, %v1852_v24 }
  0xcc   : > { %v463_v2 = vand.u32 4294901760, %v462_v0 }
  0xcd   : > { %v347_v5 = vsel %vm330_vm5, %v326_v1, 0  ;;  %v243_v6 = vpop.permute.xlu1 %242 }
  0xce   : > { %v2066_v7 = vand.u32 4294901760, %v347_v5  ;;  %vm250_vm8 = vcmp.eq.s32.totalorder %v1963_v45, %v243_v6  ;;  %1428 = vmatmul.mubr.f32.gmra.mrb[8].mxu1 %v463_v2 }
  0xcf   : > { %v1336_v10 = vsel %vm250_vm8, 1.0, %v1852_v24  ;;  %1430 = vmatprep.mubr.msk.f32.mxu1 %vm1851_vm0, %v1852_v24 }
  0xd0   : > { %v2075_v12 = vsub.f32 %v347_v5, %v2066_v7  ;;  %v271_v13 = vadd.f32 %v1336_v10, %v1329_v8 }
  0xd2   : > { %v327_v14 = vadd.f32 %v1343_v11, %v271_v13  ;;  %v471_v16 = vand.u32 4294901760, %v2075_v12 }
  0xd4   : > { %v350_v17 = vsel %vm330_vm5, %v327_v14, 0  ;;  %1506 = vmatmul.mubr.f32.gmra.mrb[10].mxu0 %v471_v16  ;;  %v472_v45 = vsub.f32 %v2075_v12, %v471_v16  ;;  %vm1069_vm5 = vcmask 261120  }
  0xd5   : > { %v2080_v18 = vand.u32 4294901760, %v350_v17  ;;  %1508 = vmatprep.mubr.msk.f32.mxu0 %vm1851_vm0, %v1852_v24 }
  0xd6   : > { %v473_v22 = vand.u32 4294901760, %v472_v45 }
  0xd7   : > { %v2085_v23 = vsub.f32 %v350_v17, %v2080_v18 }
  0xd8   : > { %1431 = vmatmul.mubr.f32.gmra.mrb[10].mxu1 %v473_v22 }
  0xd9   : > { %v481_v25 = vand.u32 4294901760, %v2085_v23  ;;  %1433 = vmatprep.mubr.msk.f32.mxu1 %vm1851_vm0, %v1852_v24 }
  0xdb   : > { %1509 = vmatmul.mubr.f32.gmra.mrb[12].mxu0 %v481_v25  ;;  %v482_v28 = vsub.f32 %v2085_v23, %v481_v25 }
  0xdc   : > { %1515 = vmatprep.mubr.msk.f32.mxu0 %vm1851_vm0, %v1852_v24 }
  0xdd   : > { %v483_v29 = vand.u32 4294901760, %v482_v28 }
  0xdf   : > { %1434 = vmatmul.mubr.f32.gmra.mrb[12].mxu1 %v483_v29  ;;  %1516 = vmatmul.mubr.f32.vlgmr.msra.gmra.mrb[0].mxu0 %v1988_v4 }
  0xe0   : > { %1440 = vmatprep.mubr.msk.f32.mxu1 %vm1851_vm0, %v1852_v24  ;;  %1518 = vmatprep.mubr.msk.f32.mxu0 %vm1851_vm0, %v1852_v24 }
  0xe1   : > { %1578 = vmatpush3.bf16.msra.mxu0 %v1926_v20 }
  0xe3   : > { %1441 = vmatmul.mubr.f32.vlgmr.msra.gmra.mrb[0].mxu1 %v1988_v4  ;;  %1519 = vmatmul.mubr.f32.gmra.mrb[2].mxu0 %v1979_v62 }
  0xe4   : > { %1569 = vmatpush3.bf16.msra.mxu1 %v1568_v41  ;;  %1443 = vmatprep.mubr.msk.f32.mxu1 %vm1851_vm0, %v1852_v24 }
  0xe5   : > { %1521 = vmatprep.mubr.msk.f32.mxu0 %vm1851_vm0, %v1852_v24 }
  0xe7   : > { %1444 = vmatmul.mubr.f32.gmra.mrb[2].mxu1 %v1979_v62  ;;  %1522 = vmatmul.mubr.f32.gmra.mrb[4].mxu0 %v2000_v15 }
  0xe8   : > { %1446 = vmatprep.mubr.msk.f32.mxu1 %vm1851_vm0, %v1852_v24  ;;  %1524 = vmatprep.mubr.msk.f32.mxu0 %vm1851_vm0, %v1852_v24 }
  0xeb   : > { %1447 = vmatmul.mubr.f32.gmra.mrb[4].mxu1 %v2000_v15  ;;  %1525 = vmatmul.mubr.f32.gmra.mrb[6].mxu0 %v2024_v37 }
  0xec   : > { %1449 = vmatprep.mubr.msk.f32.mxu1 %vm1851_vm0, %v1852_v24  ;;  %1527 = vmatprep.mubr.msk.f32.mxu0 %vm1851_vm0, %v1852_v24 }
  0xef   : > { %1450 = vmatmul.mubr.f32.gmra.mrb[6].mxu1 %v2024_v37  ;;  %1528 = vmatmul.mubr.f32.gmra.mrb[8].mxu0 %v2047_v53 }
  0xf0   : > { %1452 = vmatprep.mubr.msk.f32.mxu1 %vm1851_vm0, %v1852_v24  ;;  %1530 = vmatprep.mubr.msk.f32.mxu0 %vm1851_vm0, %v1852_v24 }
  0xf3   : > { %1453 = vmatmul.mubr.f32.gmra.mrb[8].mxu1 %v2047_v53  ;;  %1531 = vmatmul.mubr.f32.gmra.mrb[10].mxu0 %v2066_v7 }
  0xf4   : > { %1455 = vmatprep.mubr.msk.f32.mxu1 %vm1851_vm0, %v1852_v24  ;;  %1533 = vmatprep.mubr.msk.f32.mxu0 %vm1851_vm0, %v1852_v24 }
  0xf7   : > { %1456 = vmatmul.mubr.f32.gmra.mrb[10].mxu1 %v2066_v7  ;;  %1534 = vmatmul.mubr.f32.gmra.mrb[12].mxu0 %v2080_v18 }
  0xf8   : > { %1458 = vmatprep.mubr.msk.f32.mxu1 %vm1851_vm0, %v1852_v24  ;;  %1540 = vmatprep.mubr.msk.f32.mxu0 %vm1851_vm0, %v1852_v24 }
  0xfb   : > { %1459 = vmatmul.mubr.f32.gmra.mrb[12].mxu1 %v2080_v18  ;;  %1541 = vmatmul.mubr.f32.vlgmr.msra.gmra.mrb[0].mxu0 %v1988_v4 }
  0xfc   : > { %1465 = vmatprep.mubr.msk.f32.mxu1 %vm1851_vm0, %v1852_v24  ;;  %1543 = vmatprep.mubr.msk.f32.mxu0 %vm1851_vm0, %v1852_v24 }
  0xff   : > { %1466 = vmatmul.mubr.f32.vlgmr.msra.gmra.mrb[0].mxu1 %v1993_v9  ;;  %1544 = vmatmul.mubr.f32.gmra.mrb[2].mxu0 %v1979_v62 }
 0x100   : > { %1468 = vmatprep.mubr.msk.f32.mxu1 %vm1851_vm0, %v1852_v24  ;;  %1546 = vmatprep.mubr.msk.f32.mxu0 %vm1851_vm0, %v1852_v24 }
 0x103   : > { %1469 = vmatmul.mubr.f32.gmra.mrb[2].mxu1 %v1986_v3  ;;  %1547 = vmatmul.mubr.f32.gmra.mrb[4].mxu0 %v2000_v15 }
 0x104   : > { %1471 = vmatprep.mubr.msk.f32.mxu1 %vm1851_vm0, %v1852_v24  ;;  %1549 = vmatprep.mubr.msk.f32.mxu0 %vm1851_vm0, %v1852_v24 }
 0x107   : > { %1472 = vmatmul.mubr.f32.gmra.mrb[4].mxu1 %v2009_v19  ;;  %1550 = vmatmul.mubr.f32.gmra.mrb[6].mxu0 %v2024_v37 }
 0x108   : > { %1474 = vmatprep.mubr.msk.f32.mxu1 %vm1851_vm0, %v1852_v24  ;;  %1552 = vmatprep.mubr.msk.f32.mxu0 %vm1851_vm0, %v1852_v24 }
 0x10b   : > { %1475 = vmatmul.mubr.f32.gmra.mrb[6].mxu1 %v2033_v38  ;;  %1553 = vmatmul.mubr.f32.gmra.mrb[8].mxu0 %v2047_v53 }
 0x10c   : > { %1477 = vmatprep.mubr.msk.f32.mxu1 %vm1851_vm0, %v1852_v24  ;;  %1555 = vmatprep.mubr.msk.f32.mxu0 %vm1851_vm0, %v1852_v24 }
 0x10f   : > { %1478 = vmatmul.mubr.f32.gmra.mrb[8].mxu1 %v2053_v55  ;;  %1556 = vmatmul.mubr.f32.gmra.mrb[10].mxu0 %v2066_v7 }
 0x110   : > { %1480 = vmatprep.mubr.msk.f32.mxu1 %vm1851_vm0, %v1852_v24  ;;  %1558 = vmatprep.mubr.msk.f32.mxu0 %vm1851_vm0, %v1852_v24 }
 0x113   : > { %1481 = vmatmul.mubr.f32.gmra.mrb[10].mxu1 %v2075_v12  ;;  %1559 = vmatmul.mubr.f32.gmra.mrb[12].mxu0 %v2080_v18 }
 0x114   : > { %1483 = vmatprep.mubr.msk.f32.mxu1 %vm1851_vm0, %v1852_v24 }
 0x117   : > { %1484 = vmatmul.mubr.f32.gmra.mrb[12].mxu1 %v2085_v23 }
 0x1ce   : > { %v1029_v20 = vpop.f32.mrb[0].mxu0 }
 0x1cf   : > { %v1542_v26 = vpop.f32.mrb[1].mxu0 }
 0x1d2   : > { %v678_v27 = vpop.f32.mrb[0].mxu1  ;;  %v1035_v41 = vpop.f32.mrb[2].mxu0 }
 0x1d3   : > { %v1579_v62 = vadd.f32 %v1029_v20, %v678_v27  ;;  %v1467_v3 = vpop.f32.mrb[1].mxu1  ;;  %v1545_v4 = vpop.f32.mrb[3].mxu0 }
 0x1d5   : > { %1070 = vst.msk [vmem:[%s2180_s30] sm:$0xff] %vm1069_vm5, %v1579_v62 }
 0x1d6   : > { %v685_v24 = vpop.f32.mrb[2].mxu1  ;;  %v1041_v9 = vpop.f32.mrb[4].mxu0 }
 0x1d7   : > { %v1580_v15 = vadd.f32 %v1035_v41, %v685_v24  ;;  %v1470_v19 = vpop.f32.mrb[3].mxu1  ;;  %v1548_v30 = vpop.f32.mrb[5].mxu0 }
 0x1d9   : > { %1071 = vst.msk [vmem:[%s2180_s30 + $0x8] sm:$0xff] %vm1069_vm5, %v1580_v15 }
 0x1da   : > { %v692_v31 = vpop.f32.mrb[4].mxu1  ;;  %v1047_v32 = vpop.f32.mrb[6].mxu0 }
 0x1db   : > { %v1581_v33 = vadd.f32 %v1041_v9, %v692_v31  ;;  %v1473_v34 = vpop.f32.mrb[5].mxu1  ;;  %v1551_v35 = vpop.f32.mrb[7].mxu0 }
 0x1dd   : > { %1072 = vst.msk [vmem:[%s2180_s30 + $0x10] sm:$0xff] %vm1069_vm5, %v1581_v33 }
 0x1de   : > { %v699_v36 = vpop.f32.mrb[6].mxu1  ;;  %v1053_v37 = vpop.f32.mrb[8].mxu0 }
 0x1df   : > { %v1582_v38 = vadd.f32 %v1047_v32, %v699_v36  ;;  %v1476_v39 = vpop.f32.mrb[7].mxu1  ;;  %v1554_v21 = vpop.f32.mrb[9].mxu0 }
 0x1e1   : > { %1073 = vst.msk [vmem:[%s2180_s30 + $0x18] sm:$0xff] %vm1069_vm5, %v1582_v38 }
 0x1e2   : > { %v706_v40 = vpop.f32.mrb[8].mxu1  ;;  %v1059_v42 = vpop.f32.mrb[10].mxu0 }
 0x1e3   : > { %v1583_v43 = vadd.f32 %v1053_v37, %v706_v40  ;;  %v1479_v44 = vpop.f32.mrb[9].mxu1  ;;  %v1557_v46 = vpop.f32.mrb[11].mxu0 }
 0x1e5   : > { %1074 = vst.msk [vmem:[%s2180_s30 + $0x20] sm:$0xff] %vm1069_vm5, %v1583_v43 }
 0x1e6   : > { %v713_v47 = vpop.f32.mrb[10].mxu1  ;;  %v1065_v48 = vpop.f32.mrb[12].mxu0 }
 0x1e7   : > { %v1584_v49 = vadd.f32 %v1059_v42, %v713_v47  ;;  %v1482_v50 = vpop.f32.mrb[11].mxu1  ;;  %v1560_v51 = vpop.f32.mrb[13].mxu0  ;;  %1083 = sbr.rel (!%p1893_p4) target bundleno = 555 (0x22b), region = 32 }
 0x1e9   : > { %1075 = vst.msk [vmem:[%s2180_s30 + $0x28] sm:$0xff] %vm1069_vm5, %v1584_v49 }
 0x1ea   : > { %v720_v52 = vpop.f32.mrb[12].mxu1 }
 0x1eb   : > { %v1585_v53 = vadd.f32 %v1065_v48, %v720_v52  ;;  %v1485_v54 = vpop.f32.mrb[13].mxu1 }
 0x1ed   : > { %1076 = vst.msk [vmem:[%s2180_s30 + $0x30] sm:$0xff] %vm1069_vm5, %v1585_v53 }
 0x1ee   : > { %s2263_s3 = smov (!%p1086_p8, %s1085_s3), 7 }
 0x1ef   : > { %s1344_s8 = sshll.u32 %s2263_s3, 7 }
 0x1f0   : > { %p1347_p9 = scmp.eq.s32.totalorder %s1344_s8, 0 }
 0x1f1   : > { %1755 = sdivrem.u32 (!%p1347_p9), %s2263_s3, 7 }
 0x1f2   : > { %1094 = sbr.rel (%p1347_p9) target bundleno = 555 (0x22b), region = 36 }
 0x1fa   : > { %s2209_s9 = spop.drf %1755 }
 0x1fb   : > { %p1348_p10 = scmp.le.s32.totalorder %s2209_s9, 0 }
 0x1fc   : > { %s2256_s11 = smov (!%p1348_p10), %s2203_s7  ;;  %s2257_s12 = smov (!%p1348_p10), %s2180_s30 }
 0x1fd   : > { %1274 = sbr.rel (%p1348_p10) target bundleno = 526 (0x20e), region = 112  ;;  %s2218_s14 = smov (!%p1348_p10), 0  }
 0x1fe   : > { %s2220_s15 = smov (!%p1348_p10), 0  }
 0x204 LB: >> { %v1170_v55 = vld [vmem:[%s1821_s12] sm:$0xff]  ;;  %v1172_v56 = vld [vmem:[%s1821_s12 + $0x8] sm:$0xff]  ;;  %v1174_v57 = vld [vmem:[%s1821_s12 + $0x10] sm:$0xff]  ;;  %s1184_s17 = sadd.s32 1, %s1825_s14  ;;  %s1164_s15 = sadd.s32 1, %s1829_s15   ;;  %s1829_s15 = sphi %s2220_s15, %s1164_s15   ;;  %s1825_s14 = sphi %s2218_s14, %s2258_s14   ;;  %s1821_s12 = sphi %s2257_s12, %s1189_s12   ;;  %s1817_s11 = sphi %s2256_s11, %s1190_s11  }
 0x205   : >> { %1171 = vst [vmem:[%s1817_s11] sm:$0xff] %v1170_v55  ;;  %1173 = vst [vmem:[%s1817_s11 + $0x8] sm:$0xff] %v1172_v56  ;;  %v1176_v58 = vld [vmem:[%s1821_s12 + $0x18] sm:$0xff]  ;;  %v1178_v59 = vld [vmem:[%s1821_s12 + $0x20] sm:$0xff]  ;;  %p1185_p11 = scmp.ge.s32.totalorder %s1184_s17, %s2209_s9  ;;  %p1163_p12 = scmp.ge.s32.totalorder %s1164_s15, %s2209_s9 }
 0x206   : >> { %1175 = vst [vmem:[%s1817_s11 + $0x10] sm:$0xff] %v1174_v57  ;;  %v1180_v60 = vld [vmem:[%s1821_s12 + $0x28] sm:$0xff]  ;;  %1177 = vst [vmem:[%s1817_s11 + $0x18] sm:$0xff] %v1176_v58  ;;  %v1182_v61 = vld [vmem:[%s1821_s12 + $0x30] sm:$0xff] }
 0x207   : >> { %1179 = vst [vmem:[%s1817_s11 + $0x20] sm:$0xff] %v1178_v59  ;;  %1181 = vst [vmem:[%s1817_s11 + $0x28] sm:$0xff] %v1180_v60  ;;  %s2265_s17 = smov (%p1185_p11, %s1184_s17), 0  ;;  %1166 = sbr.rel (!%p1163_p12) target bundleno = 516 (0x204), region = 118 }
 0x208   : >> { %1183 = vst [vmem:[%s1817_s11 + $0x30] sm:$0xff] %v1182_v61  ;;  %s1187_s18 = smul.u32 56, %s2265_s17  ;;  %s2258_s14 = smov %s2265_s17 }
 0x20a   : >> { %s1189_s12 = scalar_lea.vmem %s2180_s30, %s1187_s18 [#allocation2]   ;;  %s1190_s11 = scalar_lea.vmem %s2203_s7, %s1187_s18  }
 0x20e PF: > { %1757 = sdivrem.u32 %s2263_s3, 7 }
 0x20f   : > { %s1349_s19 = smul.u32 56, %s2209_s9 }
 0x211   : > { %s1195_s20 = scalar_lea.vmem %s2180_s30, %s1349_s19 [#allocation2]   ;;  %s1197_s21 = scalar_lea.vmem %s2203_s7, %s1349_s19  }
 0x217   : > { %s1758_s22 = spop.drf %1757 }
 0x218   : > { %p1351_p13 = scmp.le.s32.totalorder %s1758_s22, 0 }
 0x219   : > { %s1831_s23 = smov (!%p1351_p13), %s1197_s21   ;;  %s1835_s24 = smov (!%p1351_p13), %s1195_s20  }
 0x21a   : > { %1288 = sbr.rel (%p1351_p13) target bundleno = 555 (0x22b), region = 123  ;;  %s1839_s25 = smov (!%p1351_p13), 0  }
 0x21b   : > { %s1843_s26 = smov (!%p1351_p13), 0  }
 0x221 LB: >> { %v1207_v63 = vld [vmem:[%s1837_s24] sm:$0xff]  ;;  %s1209_s27 = sadd.s32 1, %s1841_s25  ;;  %s1201_s26 = sadd.s32 1, %s1845_s26   ;;  %s1845_s26 = sphi %s1843_s26, %s1201_s26   ;;  %s1841_s25 = sphi %s1839_s25, %s1840_s25   ;;  %s1837_s24 = sphi %s1835_s24, %s1214_s24   ;;  %s1833_s23 = sphi %s1831_s23, %s1215_s23  }
 0x222   : >> { %1208 = vst [vmem:[%s1833_s23] sm:$0xff] %v1207_v63  ;;  %p1210_p0 = scmp.ge.s32.totalorder %s1209_s27, %s1758_s22  ;;  %p1200_p1 = scmp.ge.s32.totalorder %s1201_s26, %s1758_s22 }
 0x224   : >> { %s2267_s27 = smov (%p1210_p0, %s1209_s27), 0  ;;  %1203 = sbr.rel (!%p1200_p1) target bundleno = 545 (0x221), region = 129 }
 0x225   : >> { %s1352_s28 = sshll.u32 %s2267_s27, 3  ;;  %s1840_s25 = smov %s2267_s27  }
 0x226   : >> { %s1214_s24 = scalar_lea.vmem %s1195_s20, %s1352_s28 [#allocation2]   ;;  %s1215_s23 = scalar_lea.vmem %s1197_s21, %s1352_s28  }
 0x22b PF: > { %p9_p2 = scmp.ge.s32.totalorder %s1883_s13, 4   ;;  %s2259_s9 = smov %s1809_s10 }
 0x22c   : > { %s2260_s10 = smov %s1891_s16  ;;  %s2261_s11 = smov %s1883_s13 }
 0x22d   :  { %11 = sbr.rel (!%p9_p2) target bundleno = 2 (0x2), region = 140 }

</bundles_post_ra>
